<compile_context>
chip_gen: v5e
topology: v5e:2x2
jax: 0.10.0
libtpu: 0.0.40
codegen_flags: <defaults>
</compile_context>

<pallas_src>
import jax
import jax.numpy as jnp
import numpy as np
from jax.experimental import pallas as pl
from jax.experimental.pallas import tpu as pltpu

# ----------------------------- model hyper-params ---------------------------
B = 2            # batch
M = 8            # max_frames
F = 32           # feature_size
K = 8            # cluster_size
E = 2            # expansion
G = 4            # groups
EF = E * F       # 64
GK = G * K       # 32
FS = EF // G     # per-group feature size = 16
MG = M * G       # 32
OUT = FS * K     # 128  (cluster_size * FS) -- exactly one lane width
BN_EPS = 1e-5
L2_EPS = 1e-12   # F.normalize default eps


# ------------------------------- Pallas kernel ------------------------------
def nextvlad_kernel(x_ref, w1_ref, w23_ref, w4_ref, s1_ref, b1_ref,
                    a_sel_ref, r_sel_ref, b2_ref, out_ref):
    """Processes the whole batch in one grid step. All tensors live in VMEM.

    x_ref    : (B*M, F)
    w1_ref   : (F, EF)
    w23_ref  : (EF, GK + G)   columns [0:GK] = w3, [GK:GK+G] = w2
    w4_ref   : (FS, K)
    s1/b1    : (1, GK)        folded eval-mode bn1 scale / bias
    a_sel    : (FS, OUT)      a_sel[f, p] = 1 iff p // K == f
    r_sel    : (K, OUT)       r_sel[k, p] = bn2_scale[p] iff p % K == k else 0
    b2       : (1, OUT)       folded bn2 bias (flattened, lane-dense)
    out_ref  : (B, OUT)       lane-dense output (p = f*K + k, PyTorch row-major)
    """
    x = x_ref[...]                                                      # (B*M, F)
    x1 = jnp.dot(x, w1_ref[...], preferred_element_type=jnp.float32)   # (B*M, EF)

    # fused attention / activation matmul
    y = jnp.dot(x1, w23_ref[...], preferred_element_type=jnp.float32)  # (B*M, GK+G)
    act = y[:, :GK] * s1_ref[...] + b1_ref[...]                        # bn1 (eval)
    attn = jax.nn.sigmoid(y[:, GK:GK + G])                             # (B*M, G)

    # per-group softmax * attention, computed once for the whole batch
    sm = []
    for g in range(G):
        p = jax.nn.softmax(act[:, g * K:(g + 1) * K], axis=-1)         # (B*M, K)
        sm.append(p * attn[:, g:g + 1])

    # per batch row: one depth-(M*G) contraction built from tile-aligned concats
    for b in range(B):
        r0 = b * M
        xb = jnp.concatenate(
            [x1[r0:r0 + M, g * FS:(g + 1) * FS] for g in range(G)], axis=0)   # (MG, FS)
        sb = jnp.concatenate([p[r0:r0 + M] for p in sm], axis=0)              # (MG, K)

        vlad = jax.lax.dot_general(xb, sb, (((0,), (0,)), ((), ())),
                                   preferred_element_type=jnp.float32)        # (FS, K)
        a_sum = jnp.sum(sb, axis=0, keepdims=True) * (1.0 / MG)               # (1, K)
        vlad = vlad - a_sum * w4_ref[...]                                     # (FS, K)

        # L2 normalize along FS (PyTorch dim=1), division on the EUP via rsqrt
        nsq = jnp.sum(vlad * vlad, axis=0, keepdims=True)                     # (1, K)
        vlad = vlad * jax.lax.rsqrt(jnp.maximum(nsq, L2_EPS * L2_EPS))

        # exact lane-dense flatten p = f*K + k (bn2 scale folded into r_sel):
        #   u[k, p]   = vlad[p//K, k]
        #   row[p]    = vlad[p//K, p%K] * bn2_scale[p] + bn2_bias[p]
        u = jax.lax.dot_general(vlad, a_sel_ref[...], (((0,), (0,)), ((), ())),
                                preferred_element_type=jnp.float32)           # (K, OUT)
        row = jnp.sum(u * r_sel_ref[...], axis=0, keepdims=True) + b2_ref[...]
        out_ref[pl.ds(b, 1), :] = row                                         # (1, 128)


# ------------------------------ wrapper --------------------------------------
@jax.jit
def nextvlad_pallas(x, w1, w23, w4, s1, b1, a_sel, r_sel, b2):
    xr = x.reshape(B * M, F)   # free HBM reshape; keeps features on the lane axis
    return pl.pallas_call(
        nextvlad_kernel,
        out_shape=jax.ShapeDtypeStruct((B, OUT), jnp.float32),
        grid_spec=pltpu.PrefetchScalarGridSpec(
            num_scalar_prefetch=0,
            grid=(1,),                                          # single step: whole batch
            in_specs=[
                pl.BlockSpec((B * M, F), lambda i: (0, 0)),     # x (flattened)
                pl.BlockSpec((F, EF), lambda i: (0, 0)),        # w1
                pl.BlockSpec((EF, GK + G), lambda i: (0, 0)),   # [w3 | w2]
                pl.BlockSpec((FS, K), lambda i: (0, 0)),        # w4 (squeezed)
                pl.BlockSpec((1, GK), lambda i: (0, 0)),        # bn1 scale
                pl.BlockSpec((1, GK), lambda i: (0, 0)),        # bn1 bias
                pl.BlockSpec((FS, OUT), lambda i: (0, 0)),      # flatten selector (rows)
                pl.BlockSpec((K, OUT), lambda i: (0, 0)),       # flatten selector * bn2 scale
                pl.BlockSpec((1, OUT), lambda i: (0, 0)),       # bn2 bias (flat)
            ],
            out_specs=pl.BlockSpec((B, OUT), lambda i: (0, 0)), # lane-dense (B, 128)
        ),
        compiler_params=pltpu.CompilerParams(
            dimension_semantics=("arbitrary",)),
    )(xr, w1, w23, w4, s1, b1, a_sel, r_sel, b2)


# --------------------------- pure-JAX reference ------------------------------
def nextvlad_ref(x, w1, w2, w3, w4, g1, be1, rm1, rv1, g2, be2, rm2, rv2):
    xi = jnp.matmul(x, w1)                                        # (B, M, EF)
    attention = jax.nn.sigmoid(jnp.matmul(xi, w2))                # (B, M, G)
    attention = attention.reshape(-1, M * G, 1)
    ri = xi.reshape(-1, EF)
    act = jnp.matmul(ri, w3)                                      # (B*M, GK)
    act = (act - rm1) / jnp.sqrt(rv1 + BN_EPS) * g1 + be1          # bn1 (eval)
    act = act.reshape(-1, M * G, K)
    act = jax.nn.softmax(act, axis=-1)
    act = act * attention
    a_sum = jnp.mean(act, axis=-2, keepdims=True)                 # (B, 1, K)
    a = a_sum * w4                                                # (B, FS, K)
    act = jnp.transpose(act, (0, 2, 1))                           # (B, K, M*G)
    ri2 = xi.reshape(-1, M * G, FS)
    vlad = jnp.matmul(act, ri2)                                   # (B, K, FS)
    vlad = jnp.transpose(vlad, (0, 2, 1))                         # (B, FS, K)
    vlad = vlad - a
    norm = jnp.sqrt(jnp.sum(vlad * vlad, axis=1, keepdims=True))
    vlad = vlad / jnp.maximum(norm, L2_EPS)
    vlad = vlad.reshape(-1, K * FS)
    vlad = (vlad - rm2) / jnp.sqrt(rv2 + BN_EPS) * g2 + be2        # bn2 (eval)
    return vlad


# ----------------------------------- main ------------------------------------
if __name__ == "__main__":
    key = jax.random.PRNGKey(0)
    ks = jax.random.split(key, 10)

    def kaiming_uniform(k, shape, fan_in):
        bound = np.sqrt(6.0 / fan_in)
        return jax.random.uniform(k, shape, jnp.float32, -bound, bound)

    # parameters (deterministic, kaiming-uniform-like as in init_parameters)
    w1 = kaiming_uniform(ks[0], (F, EF), EF)
    w2 = kaiming_uniform(ks[1], (EF, G), G)
    w3 = kaiming_uniform(ks[2], (EF, GK), GK)
    w4 = kaiming_uniform(ks[3], (1, FS, K), K)

    # BatchNorm params (eval mode): slightly randomized affine, default stats
    g1 = 1.0 + 0.1 * jax.random.normal(ks[4], (GK,), jnp.float32)
    be1 = 0.1 * jax.random.normal(ks[5], (GK,), jnp.float32)
    rm1 = jnp.zeros((GK,), jnp.float32)
    rv1 = jnp.ones((GK,), jnp.float32)
    g2 = 1.0 + 0.1 * jax.random.normal(ks[6], (OUT,), jnp.float32)
    be2 = 0.1 * jax.random.normal(ks[7], (OUT,), jnp.float32)
    rm2 = jnp.zeros((OUT,), jnp.float32)
    rv2 = jnp.ones((OUT,), jnp.float32)

    # fold BN1 into scale/bias
    s1 = (g1 / jnp.sqrt(rv1 + BN_EPS)).reshape(1, GK)
    b1 = (be1 - rm1 * g1 / jnp.sqrt(rv1 + BN_EPS)).reshape(1, GK)

    # fold BN2 into lane-dense flat scale/bias (flat index p = f*K + k)
    s2f = g2 / jnp.sqrt(rv2 + BN_EPS)                               # (OUT,)
    b2f = (be2 - rm2 * s2f).reshape(1, OUT)

    # exact flatten selectors
    p_idx = jnp.arange(OUT)
    a_sel = (p_idx[None, :] // K == jnp.arange(FS)[:, None]).astype(jnp.float32)   # (FS, OUT)
    r_sel = ((p_idx[None, :] % K) == jnp.arange(K)[:, None]).astype(jnp.float32) \
        * s2f[None, :]                                                              # (K, OUT)

    # fused attention/activation weight: columns [0:GK] = w3, [GK:GK+G] = w2
    w23 = jnp.concatenate([w3, w2], axis=1)                          # (EF, GK+G)
    w4_2d = w4[0]                                                    # (FS, K)

    # input: (batch, max_frames, feature_size)
    x = jax.random.normal(ks[8], (B, M, F), jnp.float32)

    out = nextvlad_pallas(x, w1, w23, w4_2d, s1, b1, a_sel, r_sel, b2f)
    out = jax.block_until_ready(out)

    ref = nextvlad_ref(x, w1, w2, w3, w4, g1, be1, rm1, rv1, g2, be2, rm2, rv2)
    ref = jax.block_until_ready(ref)

    assert out.shape == (B, K * FS), out.shape
    np.testing.assert_allclose(np.asarray(out), np.asarray(ref),
                               rtol=1e-5, atol=1e-5)
    print("KERNEL_OK")
</pallas_src>

<mosaic_0001>
module attributes {stable_mosaic.version = 11 : i64} {
  func.func @nextvlad_kernel(%arg0: i32, %arg1: memref<16x32xf32, #tpu.memory_space<vmem>>, %arg2: memref<32x64xf32, #tpu.memory_space<vmem>>, %arg3: memref<64x36xf32, #tpu.memory_space<vmem>>, %arg4: memref<16x8xf32, #tpu.memory_space<vmem>>, %arg5: memref<1x32xf32, #tpu.memory_space<vmem>>, %arg6: memref<1x32xf32, #tpu.memory_space<vmem>>, %arg7: memref<16x128xf32, #tpu.memory_space<vmem>>, %arg8: memref<8x128xf32, #tpu.memory_space<vmem>>, %arg9: memref<1x128xf32, #tpu.memory_space<vmem>>, %arg10: memref<2x128xf32, #tpu.memory_space<vmem>>) attributes {dimension_semantics = [#tpu.dimension_semantics<arbitrary>], iteration_bounds = array<i64: 1>, scalar_prefetch = 0 : i64, scratch_operands = 0 : i64, tpu.core_type = #tpu.core_type<tc>, window_params = [{pipeline_mode = #tpu.pipeline_mode<synchronous>, transform_indices = @transform_0, window_bounds = array<i64: 16, 32>}, {pipeline_mode = #tpu.pipeline_mode<synchronous>, transform_indices = @transform_1, window_bounds = array<i64: 32, 64>}, {pipeline_mode = #tpu.pipeline_mode<synchronous>, transform_indices = @transform_2, window_bounds = array<i64: 64, 36>}, {pipeline_mode = #tpu.pipeline_mode<synchronous>, transform_indices = @transform_3, window_bounds = array<i64: 16, 8>}, {pipeline_mode = #tpu.pipeline_mode<synchronous>, transform_indices = @transform_4, window_bounds = array<i64: 1, 32>}, {pipeline_mode = #tpu.pipeline_mode<synchronous>, transform_indices = @transform_5, window_bounds = array<i64: 1, 32>}, {pipeline_mode = #tpu.pipeline_mode<synchronous>, transform_indices = @transform_6, window_bounds = array<i64: 16, 128>}, {pipeline_mode = #tpu.pipeline_mode<synchronous>, transform_indices = @transform_7, window_bounds = array<i64: 8, 128>}, {pipeline_mode = #tpu.pipeline_mode<synchronous>, transform_indices = @transform_8, window_bounds = array<i64: 1, 128>}, {pipeline_mode = #tpu.pipeline_mode<synchronous>, transform_indices = @transform_9, window_bounds = array<i64: 2, 128>}]} {
    %c0 = arith.constant 0 : index
    %c0_0 = arith.constant 0 : index
    %0 = vector.load %arg1[%c0, %c0_0] : memref<16x32xf32, #tpu.memory_space<vmem>>, vector<16x32xf32>
    %c0_1 = arith.constant 0 : index
    %c0_2 = arith.constant 0 : index
    %1 = vector.load %arg2[%c0_1, %c0_2] : memref<32x64xf32, #tpu.memory_space<vmem>>, vector<32x64xf32>
    %cst = arith.constant dense<0.000000e+00> : vector<16x64xf32>
    %2 = tpu.matmul %0, %1, %cst {dimension_numbers = #tpu.dot_dimension_numbers<[1], [0], [0], [1], [0, 0, 1, 1], [], []>} : vector<16x32xf32>, vector<32x64xf32>, vector<16x64xf32> -> vector<16x64xf32>
    %c0_3 = arith.constant 0 : index
    %c0_4 = arith.constant 0 : index
    %3 = vector.load %arg3[%c0_3, %c0_4] : memref<64x36xf32, #tpu.memory_space<vmem>>, vector<64x36xf32>
    %cst_5 = arith.constant dense<0.000000e+00> : vector<16x36xf32>
    %4 = tpu.matmul %2, %3, %cst_5 {dimension_numbers = #tpu.dot_dimension_numbers<[1], [0], [0], [1], [0, 0, 1, 1], [], []>} : vector<16x64xf32>, vector<64x36xf32>, vector<16x36xf32> -> vector<16x36xf32>
    %5 = vector.extract_strided_slice %4 {offsets = [0, 0], sizes = [16, 32], strides = [1, 1]} : vector<16x36xf32> to vector<16x32xf32>
    %c0_6 = arith.constant 0 : index
    %c0_7 = arith.constant 0 : index
    %6 = vector.load %arg5[%c0_6, %c0_7] : memref<1x32xf32, #tpu.memory_space<vmem>>, vector<1x32xf32>
    %7 = vector.broadcast %6 : vector<1x32xf32> to vector<16x32xf32>
    %8 = arith.mulf %5, %7 : vector<16x32xf32>
    %c0_8 = arith.constant 0 : index
    %c0_9 = arith.constant 0 : index
    %9 = vector.load %arg6[%c0_8, %c0_9] : memref<1x32xf32, #tpu.memory_space<vmem>>, vector<1x32xf32>
    %10 = vector.broadcast %9 : vector<1x32xf32> to vector<16x32xf32>
    %11 = arith.addf %8, %10 : vector<16x32xf32>
    %12 = vector.extract_strided_slice %4 {offsets = [0, 32], sizes = [16, 4], strides = [1, 1]} : vector<16x36xf32> to vector<16x4xf32>
    %13 = arith.negf %12 : vector<16x4xf32>
    %14 = math.exp %13 : vector<16x4xf32>
    %cst_10 = arith.constant 1.000000e+00 : f32
    %15 = vector.broadcast %cst_10 : f32 to vector<16x4xf32>
    %16 = arith.addf %15, %14 : vector<16x4xf32>
    %17 = arith.divf %15, %16 : vector<16x4xf32>
    %18 = vector.extract_strided_slice %11 {offsets = [0, 0], sizes = [16, 8], strides = [1, 1]} : vector<16x32xf32> to vector<16x8xf32>
    %cst_11 = arith.constant dense<0xFF800000> : vector<16xf32>
    %19 = vector.multi_reduction <maximumf>, %18, %cst_11 [1] : vector<16x8xf32> to vector<16xf32>
    %cst_12 = arith.constant 0xFF800000 : f32
    %20 = vector.broadcast %cst_12 : f32 to vector<16xf32>
    %21 = arith.maximumf %20, %19 : vector<16xf32>
    %22 = vector.shape_cast %21 : vector<16xf32> to vector<16x1xf32>
    %23 = vector.broadcast %22 : vector<16x1xf32> to vector<16x8xf32>
    %24 = arith.subf %18, %23 : vector<16x8xf32>
    %25 = math.exp %24 : vector<16x8xf32>
    %cst_13 = arith.constant dense<0.000000e+00> : vector<16xf32>
    %26 = vector.multi_reduction <add>, %25, %cst_13 [1] : vector<16x8xf32> to vector<16xf32>
    %27 = vector.shape_cast %26 : vector<16xf32> to vector<16x1xf32>
    %28 = vector.broadcast %27 : vector<16x1xf32> to vector<16x8xf32>
    %29 = arith.divf %25, %28 : vector<16x8xf32>
    %30 = vector.extract_strided_slice %17 {offsets = [0, 0], sizes = [16, 1], strides = [1, 1]} : vector<16x4xf32> to vector<16x1xf32>
    %31 = vector.broadcast %30 : vector<16x1xf32> to vector<16x8xf32>
    %32 = arith.mulf %29, %31 : vector<16x8xf32>
    %33 = vector.extract_strided_slice %11 {offsets = [0, 8], sizes = [16, 8], strides = [1, 1]} : vector<16x32xf32> to vector<16x8xf32>
    %cst_14 = arith.constant dense<0xFF800000> : vector<16xf32>
    %34 = vector.multi_reduction <maximumf>, %33, %cst_14 [1] : vector<16x8xf32> to vector<16xf32>
    %cst_15 = arith.constant 0xFF800000 : f32
    %35 = vector.broadcast %cst_15 : f32 to vector<16xf32>
    %36 = arith.maximumf %35, %34 : vector<16xf32>
    %37 = vector.shape_cast %36 : vector<16xf32> to vector<16x1xf32>
    %38 = vector.broadcast %37 : vector<16x1xf32> to vector<16x8xf32>
    %39 = arith.subf %33, %38 : vector<16x8xf32>
    %40 = math.exp %39 : vector<16x8xf32>
    %cst_16 = arith.constant dense<0.000000e+00> : vector<16xf32>
    %41 = vector.multi_reduction <add>, %40, %cst_16 [1] : vector<16x8xf32> to vector<16xf32>
    %42 = vector.shape_cast %41 : vector<16xf32> to vector<16x1xf32>
    %43 = vector.broadcast %42 : vector<16x1xf32> to vector<16x8xf32>
    %44 = arith.divf %40, %43 : vector<16x8xf32>
    %45 = vector.extract_strided_slice %17 {offsets = [0, 1], sizes = [16, 1], strides = [1, 1]} : vector<16x4xf32> to vector<16x1xf32>
    %46 = vector.broadcast %45 : vector<16x1xf32> to vector<16x8xf32>
    %47 = arith.mulf %44, %46 : vector<16x8xf32>
    %48 = vector.extract_strided_slice %11 {offsets = [0, 16], sizes = [16, 8], strides = [1, 1]} : vector<16x32xf32> to vector<16x8xf32>
    %cst_17 = arith.constant dense<0xFF800000> : vector<16xf32>
    %49 = vector.multi_reduction <maximumf>, %48, %cst_17 [1] : vector<16x8xf32> to vector<16xf32>
    %cst_18 = arith.constant 0xFF800000 : f32
    %50 = vector.broadcast %cst_18 : f32 to vector<16xf32>
    %51 = arith.maximumf %50, %49 : vector<16xf32>
    %52 = vector.shape_cast %51 : vector<16xf32> to vector<16x1xf32>
    %53 = vector.broadcast %52 : vector<16x1xf32> to vector<16x8xf32>
    %54 = arith.subf %48, %53 : vector<16x8xf32>
    %55 = math.exp %54 : vector<16x8xf32>
    %cst_19 = arith.constant dense<0.000000e+00> : vector<16xf32>
    %56 = vector.multi_reduction <add>, %55, %cst_19 [1] : vector<16x8xf32> to vector<16xf32>
    %57 = vector.shape_cast %56 : vector<16xf32> to vector<16x1xf32>
    %58 = vector.broadcast %57 : vector<16x1xf32> to vector<16x8xf32>
    %59 = arith.divf %55, %58 : vector<16x8xf32>
    %60 = vector.extract_strided_slice %17 {offsets = [0, 2], sizes = [16, 1], strides = [1, 1]} : vector<16x4xf32> to vector<16x1xf32>
    %61 = vector.broadcast %60 : vector<16x1xf32> to vector<16x8xf32>
    %62 = arith.mulf %59, %61 : vector<16x8xf32>
    %63 = vector.extract_strided_slice %11 {offsets = [0, 24], sizes = [16, 8], strides = [1, 1]} : vector<16x32xf32> to vector<16x8xf32>
    %cst_20 = arith.constant dense<0xFF800000> : vector<16xf32>
    %64 = vector.multi_reduction <maximumf>, %63, %cst_20 [1] : vector<16x8xf32> to vector<16xf32>
    %cst_21 = arith.constant 0xFF800000 : f32
    %65 = vector.broadcast %cst_21 : f32 to vector<16xf32>
    %66 = arith.maximumf %65, %64 : vector<16xf32>
    %67 = vector.shape_cast %66 : vector<16xf32> to vector<16x1xf32>
    %68 = vector.broadcast %67 : vector<16x1xf32> to vector<16x8xf32>
    %69 = arith.subf %63, %68 : vector<16x8xf32>
    %70 = math.exp %69 : vector<16x8xf32>
    %cst_22 = arith.constant dense<0.000000e+00> : vector<16xf32>
    %71 = vector.multi_reduction <add>, %70, %cst_22 [1] : vector<16x8xf32> to vector<16xf32>
    %72 = vector.shape_cast %71 : vector<16xf32> to vector<16x1xf32>
    %73 = vector.broadcast %72 : vector<16x1xf32> to vector<16x8xf32>
    %74 = arith.divf %70, %73 : vector<16x8xf32>
    %75 = vector.extract_strided_slice %17 {offsets = [0, 3], sizes = [16, 1], strides = [1, 1]} : vector<16x4xf32> to vector<16x1xf32>
    %76 = vector.broadcast %75 : vector<16x1xf32> to vector<16x8xf32>
    %77 = arith.mulf %74, %76 : vector<16x8xf32>
    %78 = vector.extract_strided_slice %2 {offsets = [0, 0], sizes = [8, 16], strides = [1, 1]} : vector<16x64xf32> to vector<8x16xf32>
    %79 = vector.extract_strided_slice %2 {offsets = [0, 16], sizes = [8, 16], strides = [1, 1]} : vector<16x64xf32> to vector<8x16xf32>
    %80 = vector.extract_strided_slice %2 {offsets = [0, 32], sizes = [8, 16], strides = [1, 1]} : vector<16x64xf32> to vector<8x16xf32>
    %81 = vector.extract_strided_slice %2 {offsets = [0, 48], sizes = [8, 16], strides = [1, 1]} : vector<16x64xf32> to vector<8x16xf32>
    %82 = tpu.concatenate %78, %79, %80, %81 in 0 : vector<8x16xf32>, vector<8x16xf32>, vector<8x16xf32>, vector<8x16xf32> -> vector<32x16xf32>
    %83 = vector.extract_strided_slice %32 {offsets = [0, 0], sizes = [8, 8], strides = [1, 1]} : vector<16x8xf32> to vector<8x8xf32>
    %84 = vector.extract_strided_slice %47 {offsets = [0, 0], sizes = [8, 8], strides = [1, 1]} : vector<16x8xf32> to vector<8x8xf32>
    %85 = vector.extract_strided_slice %62 {offsets = [0, 0], sizes = [8, 8], strides = [1, 1]} : vector<16x8xf32> to vector<8x8xf32>
    %86 = vector.extract_strided_slice %77 {offsets = [0, 0], sizes = [8, 8], strides = [1, 1]} : vector<16x8xf32> to vector<8x8xf32>
    %87 = tpu.concatenate %83, %84, %85, %86 in 0 : vector<8x8xf32>, vector<8x8xf32>, vector<8x8xf32>, vector<8x8xf32> -> vector<32x8xf32>
    %cst_23 = arith.constant dense<0.000000e+00> : vector<16x8xf32>
    %88 = tpu.matmul %82, %87, %cst_23 {dimension_numbers = #tpu.dot_dimension_numbers<[0], [0], [1], [1], [0, 1, 1, 1], [], []>} : vector<32x16xf32>, vector<32x8xf32>, vector<16x8xf32> -> vector<16x8xf32>
    %cst_24 = arith.constant dense<0.000000e+00> : vector<8xf32>
    %89 = vector.multi_reduction <add>, %87, %cst_24 [0] : vector<32x8xf32> to vector<8xf32>
    %90 = vector.shape_cast %89 : vector<8xf32> to vector<1x8xf32>
    %cst_25 = arith.constant 3.125000e-02 : f32
    %91 = vector.broadcast %cst_25 : f32 to vector<1x8xf32>
    %92 = arith.mulf %90, %91 : vector<1x8xf32>
    %c0_26 = arith.constant 0 : index
    %c0_27 = arith.constant 0 : index
    %93 = vector.load %arg4[%c0_26, %c0_27] : memref<16x8xf32, #tpu.memory_space<vmem>>, vector<16x8xf32>
    %94 = vector.broadcast %92 : vector<1x8xf32> to vector<16x8xf32>
    %95 = arith.mulf %94, %93 : vector<16x8xf32>
    %96 = arith.subf %88, %95 : vector<16x8xf32>
    %97 = arith.mulf %96, %96 : vector<16x8xf32>
    %cst_28 = arith.constant dense<0.000000e+00> : vector<8xf32>
    %98 = vector.multi_reduction <add>, %97, %cst_28 [0] : vector<16x8xf32> to vector<8xf32>
    %99 = vector.shape_cast %98 : vector<8xf32> to vector<1x8xf32>
    %cst_29 = arith.constant 1.000000e-24 : f32
    %100 = vector.broadcast %cst_29 : f32 to vector<1x8xf32>
    %101 = arith.maximumf %99, %100 : vector<1x8xf32>
    %102 = math.rsqrt %101 : vector<1x8xf32>
    %103 = vector.broadcast %102 : vector<1x8xf32> to vector<16x8xf32>
    %104 = arith.mulf %96, %103 : vector<16x8xf32>
    %c0_30 = arith.constant 0 : index
    %c0_31 = arith.constant 0 : index
    %105 = vector.load %arg7[%c0_30, %c0_31] : memref<16x128xf32, #tpu.memory_space<vmem>>, vector<16x128xf32>
    %cst_32 = arith.constant dense<0.000000e+00> : vector<8x128xf32>
    %106 = tpu.matmul %104, %105, %cst_32 {dimension_numbers = #tpu.dot_dimension_numbers<[0], [0], [1], [1], [0, 1, 1, 1], [], []>} : vector<16x8xf32>, vector<16x128xf32>, vector<8x128xf32> -> vector<8x128xf32>
    %c0_33 = arith.constant 0 : index
    %c0_34 = arith.constant 0 : index
    %107 = vector.load %arg8[%c0_33, %c0_34] : memref<8x128xf32, #tpu.memory_space<vmem>>, vector<8x128xf32>
    %108 = arith.mulf %106, %107 : vector<8x128xf32>
    %cst_35 = arith.constant dense<0.000000e+00> : vector<128xf32>
    %109 = vector.multi_reduction <add>, %108, %cst_35 [0] : vector<8x128xf32> to vector<128xf32>
    %110 = vector.shape_cast %109 : vector<128xf32> to vector<1x128xf32>
    %c0_36 = arith.constant 0 : index
    %c0_37 = arith.constant 0 : index
    %111 = vector.load %arg9[%c0_36, %c0_37] : memref<1x128xf32, #tpu.memory_space<vmem>>, vector<1x128xf32>
    %112 = arith.addf %110, %111 : vector<1x128xf32>
    %c0_38 = arith.constant 0 : index
    %c0_39 = arith.constant 0 : index
    %113 = vector.load %arg10[%c0_38, %c0_39] : memref<2x128xf32, #tpu.memory_space<vmem>>, vector<1x128xf32>
    tpu.vector_store %arg10[%c0_38, %c0_39], %112 {strides = array<i32>} : memref<2x128xf32, #tpu.memory_space<vmem>>, vector<1x128xf32>,
    %114 = vector.extract_strided_slice %2 {offsets = [8, 0], sizes = [8, 16], strides = [1, 1]} : vector<16x64xf32> to vector<8x16xf32>
    %115 = vector.extract_strided_slice %2 {offsets = [8, 16], sizes = [8, 16], strides = [1, 1]} : vector<16x64xf32> to vector<8x16xf32>
    %116 = vector.extract_strided_slice %2 {offsets = [8, 32], sizes = [8, 16], strides = [1, 1]} : vector<16x64xf32> to vector<8x16xf32>
    %117 = vector.extract_strided_slice %2 {offsets = [8, 48], sizes = [8, 16], strides = [1, 1]} : vector<16x64xf32> to vector<8x16xf32>
    %118 = tpu.concatenate %114, %115, %116, %117 in 0 : vector<8x16xf32>, vector<8x16xf32>, vector<8x16xf32>, vector<8x16xf32> -> vector<32x16xf32>
    %119 = vector.extract_strided_slice %32 {offsets = [8, 0], sizes = [8, 8], strides = [1, 1]} : vector<16x8xf32> to vector<8x8xf32>
    %120 = vector.extract_strided_slice %47 {offsets = [8, 0], sizes = [8, 8], strides = [1, 1]} : vector<16x8xf32> to vector<8x8xf32>
    %121 = vector.extract_strided_slice %62 {offsets = [8, 0], sizes = [8, 8], strides = [1, 1]} : vector<16x8xf32> to vector<8x8xf32>
    %122 = vector.extract_strided_slice %77 {offsets = [8, 0], sizes = [8, 8], strides = [1, 1]} : vector<16x8xf32> to vector<8x8xf32>
    %123 = tpu.concatenate %119, %120, %121, %122 in 0 : vector<8x8xf32>, vector<8x8xf32>, vector<8x8xf32>, vector<8x8xf32> -> vector<32x8xf32>
    %cst_40 = arith.constant dense<0.000000e+00> : vector<16x8xf32>
    %124 = tpu.matmul %118, %123, %cst_40 {dimension_numbers = #tpu.dot_dimension_numbers<[0], [0], [1], [1], [0, 1, 1, 1], [], []>} : vector<32x16xf32>, vector<32x8xf32>, vector<16x8xf32> -> vector<16x8xf32>
    %cst_41 = arith.constant dense<0.000000e+00> : vector<8xf32>
    %125 = vector.multi_reduction <add>, %123, %cst_41 [0] : vector<32x8xf32> to vector<8xf32>
    %126 = vector.shape_cast %125 : vector<8xf32> to vector<1x8xf32>
    %cst_42 = arith.constant 3.125000e-02 : f32
    %127 = vector.broadcast %cst_42 : f32 to vector<1x8xf32>
    %128 = arith.mulf %126, %127 : vector<1x8xf32>
    %c0_43 = arith.constant 0 : index
    %c0_44 = arith.constant 0 : index
    %129 = vector.load %arg4[%c0_43, %c0_44] : memref<16x8xf32, #tpu.memory_space<vmem>>, vector<16x8xf32>
    %130 = vector.broadcast %128 : vector<1x8xf32> to vector<16x8xf32>
    %131 = arith.mulf %130, %129 : vector<16x8xf32>
    %132 = arith.subf %124, %131 : vector<16x8xf32>
    %133 = arith.mulf %132, %132 : vector<16x8xf32>
    %cst_45 = arith.constant dense<0.000000e+00> : vector<8xf32>
    %134 = vector.multi_reduction <add>, %133, %cst_45 [0] : vector<16x8xf32> to vector<8xf32>
    %135 = vector.shape_cast %134 : vector<8xf32> to vector<1x8xf32>
    %cst_46 = arith.constant 1.000000e-24 : f32
    %136 = vector.broadcast %cst_46 : f32 to vector<1x8xf32>
    %137 = arith.maximumf %135, %136 : vector<1x8xf32>
    %138 = math.rsqrt %137 : vector<1x8xf32>
    %139 = vector.broadcast %138 : vector<1x8xf32> to vector<16x8xf32>
    %140 = arith.mulf %132, %139 : vector<16x8xf32>
    %c0_47 = arith.constant 0 : index
    %c0_48 = arith.constant 0 : index
    %141 = vector.load %arg7[%c0_47, %c0_48] : memref<16x128xf32, #tpu.memory_space<vmem>>, vector<16x128xf32>
    %cst_49 = arith.constant dense<0.000000e+00> : vector<8x128xf32>
    %142 = tpu.matmul %140, %141, %cst_49 {dimension_numbers = #tpu.dot_dimension_numbers<[0], [0], [1], [1], [0, 1, 1, 1], [], []>} : vector<16x8xf32>, vector<16x128xf32>, vector<8x128xf32> -> vector<8x128xf32>
    %c0_50 = arith.constant 0 : index
    %c0_51 = arith.constant 0 : index
    %143 = vector.load %arg8[%c0_50, %c0_51] : memref<8x128xf32, #tpu.memory_space<vmem>>, vector<8x128xf32>
    %144 = arith.mulf %142, %143 : vector<8x128xf32>
    %cst_52 = arith.constant dense<0.000000e+00> : vector<128xf32>
    %145 = vector.multi_reduction <add>, %144, %cst_52 [0] : vector<8x128xf32> to vector<128xf32>
    %146 = vector.shape_cast %145 : vector<128xf32> to vector<1x128xf32>
    %c0_53 = arith.constant 0 : index
    %c0_54 = arith.constant 0 : index
    %147 = vector.load %arg9[%c0_53, %c0_54] : memref<1x128xf32, #tpu.memory_space<vmem>>, vector<1x128xf32>
    %148 = arith.addf %146, %147 : vector<1x128xf32>
    %c1 = arith.constant 1 : index
    %c0_55 = arith.constant 0 : index
    %149 = vector.load %arg10[%c1, %c0_55] : memref<2x128xf32, #tpu.memory_space<vmem>>, vector<1x128xf32>
    tpu.vector_store %arg10[%c1, %c0_55], %148 {strides = array<i32>} : memref<2x128xf32, #tpu.memory_space<vmem>>, vector<1x128xf32>,
    return
  }
  func.func @transform_0(%arg0: i32) -> (i32, i32) {
    %c0_i32 = arith.constant 0 : i32
    %c0_i32_0 = arith.constant 0 : i32
    %c0_i32_1 = arith.constant 0 : i32
    return %c0_i32, %c0_i32_0 : i32, i32
  }
  func.func @transform_1(%arg0: i32) -> (i32, i32) {
    %c0_i32 = arith.constant 0 : i32
    %c0_i32_0 = arith.constant 0 : i32
    %c0_i32_1 = arith.constant 0 : i32
    return %c0_i32, %c0_i32_0 : i32, i32
  }
  func.func @transform_2(%arg0: i32) -> (i32, i32) {
    %c0_i32 = arith.constant 0 : i32
    %c0_i32_0 = arith.constant 0 : i32
    %c0_i32_1 = arith.constant 0 : i32
    return %c0_i32, %c0_i32_0 : i32, i32
  }
  func.func @transform_3(%arg0: i32) -> (i32, i32) {
    %c0_i32 = arith.constant 0 : i32
    %c0_i32_0 = arith.constant 0 : i32
    %c0_i32_1 = arith.constant 0 : i32
    return %c0_i32, %c0_i32_0 : i32, i32
  }
  func.func @transform_4(%arg0: i32) -> (i32, i32) {
    %c0_i32 = arith.constant 0 : i32
    %c0_i32_0 = arith.constant 0 : i32
    %c0_i32_1 = arith.constant 0 : i32
    return %c0_i32, %c0_i32_0 : i32, i32
  }
  func.func @transform_5(%arg0: i32) -> (i32, i32) {
    %c0_i32 = arith.constant 0 : i32
    %c0_i32_0 = arith.constant 0 : i32
    %c0_i32_1 = arith.constant 0 : i32
    return %c0_i32, %c0_i32_0 : i32, i32
  }
  func.func @transform_6(%arg0: i32) -> (i32, i32) {
    %c0_i32 = arith.constant 0 : i32
    %c0_i32_0 = arith.constant 0 : i32
    %c0_i32_1 = arith.constant 0 : i32
    return %c0_i32, %c0_i32_0 : i32, i32
  }
  func.func @transform_7(%arg0: i32) -> (i32, i32) {
    %c0_i32 = arith.constant 0 : i32
    %c0_i32_0 = arith.constant 0 : i32
    %c0_i32_1 = arith.constant 0 : i32
    return %c0_i32, %c0_i32_0 : i32, i32
  }
  func.func @transform_8(%arg0: i32) -> (i32, i32) {
    %c0_i32 = arith.constant 0 : i32
    %c0_i32_0 = arith.constant 0 : i32
    %c0_i32_1 = arith.constant 0 : i32
    return %c0_i32, %c0_i32_0 : i32, i32
  }
  func.func @transform_9(%arg0: i32) -> (i32, i32) {
    %c0_i32 = arith.constant 0 : i32
    %c0_i32_0 = arith.constant 0 : i32
    %c0_i32_1 = arith.constant 0 : i32
    return %c0_i32, %c0_i32_0 : i32, i32
  }
}

</mosaic_0001>

<bundles_post_ra>
// kernel: nextvlad_pallas.1
= control target key start
LH: loop header
LB: loop body
LE: loop exit
PB: predicated region body
PF: predicated region fallthrough
CT: control target
= control target key end

     0   :  { %s1222_s0 = inlined_call_operand.vmem [shape: f32[16,32], index: 0, kind: input, shape index: {}]   ;;  %s1223_s1 = inlined_call_operand.vmem [shape: f32[32,64], index: 1, kind: input, shape index: {}]   ;;  %s1224_s2 = inlined_call_operand.vmem [shape: f32[64,36], index: 2, kind: input, shape index: {}]   ;;  %s1225_s3 = inlined_call_operand.vmem [shape: f32[16,8], index: 3, kind: input, shape index: {}]   ;;  %s1226_s4 = inlined_call_operand.vmem [shape: f32[1,32], index: 4, kind: input, shape index: {}]   ;;  %s1227_s5 = inlined_call_operand.vmem [shape: f32[1,32], index: 5, kind: input, shape index: {}]   ;;  %s1228_s6 = inlined_call_operand.vmem [shape: f32[16,128], index: 6, kind: input, shape index: {}]   ;;  %s1229_s7 = inlined_call_operand.vmem [shape: f32[8,128], index: 7, kind: input, shape index: {}]   ;;  %s1230_s8 = inlined_call_operand.vmem [shape: f32[1,128], index: 8, kind: input, shape index: {}]   ;;  %s1231_s9 = inlined_call_operand.hbm [shape: f32[2,128], index: 9, kind: output, shape index: {}]  }
   0x1   :  { %v38_v0 = vld [vmem:[%s1223_s1 + $0x18] sm:$0xff]  ;;  %v37_v1 = vld [vmem:[%s1223_s1 + $0x10] sm:$0xff]  ;;  %v36_v3 = vld [vmem:[%s1223_s1 + $0x8] sm:$0xff] }
   0x2   :  { %58 = vmatpush.msra.mxu0 %v38_v0  ;;  %v76_v2 = vld [vmem:[%s1224_s2 + $0x38] sm:$0xff]  ;;  %v75_v4 = vld [vmem:[%s1224_s2 + $0x30] sm:$0xff]  ;;  %v35_v5 = vld [vmem:[%s1223_s1] sm:$0xff] }
   0x3   :  { %92 = vmatpush.msra.mxu1 %v76_v2  ;;  %v74_v6 = vld [vmem:[%s1224_s2 + $0x28] sm:$0xff] }
   0x4   :  { %59 = vmatpush.msra.mxu0 %v37_v1 }
   0x5   :  { %93 = vmatpush.msra.mxu1 %v75_v4 }
   0x6   :  { %14 = vsyncpa [#allocation3], 0  ;;  %60 = vmatpush.msra.mxu0 %v36_v3  ;;  %v33_v7 = vld [vmem:[%s1222_s0] sm:$0xff]  ;;  %vm39_vm0 = vcmask 261120   ;;  %v72_v9 = vld [vmem:[%s1224_s2 + $0x18] sm:$0xff]  ;;  %vm77_vm1 = vcmask 523264  }
   0x7   :  { %v73_v8 = vld [vmem:[%s1224_s2 + $0x20] sm:$0xff]  ;;  %94 = vmatpush.msra.mxu1 %v74_v6  ;;  %v71_v10 = vld [vmem:[%s1224_s2 + $0x10] sm:$0xff]  ;;  %v70_v11 = vld [vmem:[%s1224_s2 + $0x8] sm:$0xff]  ;;  %vm352_vm2 = vcmask 261312   ;;  %vm218_vm3 = vcmask 130112   ;;  %vm285_vm4 = vcmask 195712  }
   0x8   :  { %61 = vmatpush.msra.mxu0 %v35_v5  ;;  %v69_v12 = vld [vmem:[%s1224_s2] sm:$0xff]  ;;  %v34_v14 = vld [vmem:[%s1222_s0 + $0x8] sm:$0xff]  ;;  %vm157_vm5 = vcmask 64512   ;;  %v927_v27 = vmov 35   ;;  %s928_s0 = smov 104   ;;  %v930_v51 = vmov 33  }
   0x9   :  { %824 = vmatmul.msk.f32.vlgmr.msra.gmra.mxu0 %vm39_vm0, %v33_v7  ;;  %95 = vmatpush.msra.mxu1 %v73_v8  ;;  %v1038_v15 = vld [vmem:[%s1226_s4] ss:$0 sm:$0xff]  ;;  %s929_s4 = smov 112   ;;  %v932_v52 = vmov 32   ;;  %v933_v58 = vmov 34   ;;  %s934_s18 = smov 96  }
   0xa   :  { %v1043_v16 = vld [vmem:[%s1227_s5] ss:$0 sm:$0xff]  ;;  %847 = vset.pattern.permute.xlu1 %v927_v27  ;;  %s931_s5 = smov 120   ;;  %848 = vset.pattern.permute.xlu0 %v933_v58  ;;  %s935_s19 = smov 80  }
   0xb   :  { %96 = vmatpush.msra.mxu1 %v72_v9  ;;  %s936_s30 = smov [#allocation2]   ;;  %s815_s13 = sshll.u32 %s1231_s9, 4  ;;  %s816_s13 = int_to_ptr.hbm [resolvable:$true] %s815_s13 }
   0xc   :  { %s813_s10 = sshll.u32 %s936_s30, 4  ;;  %s814_s10 = int_to_ptr.vmem [resolvable:$true] %s813_s10 }
   0xd   :  { %97 = vmatpush.msra.mxu1 %v71_v10 }
   0xf   :  { %98 = vmatpush.msra.mxu1 %v70_v11 }
  0x11   :  { %99 = vmatpush.msra.mxu1 %v69_v12  ;;  %825 = vmatmul.msk.f32.gmra.mxu0 %vm39_vm0, %v34_v14 }
  0x86   :  { %v1027_v13 = vpop.f32.mrf.mxu0 }
  0x87   :  { %826 = vmatmul.msk.f32.vlgmr.msra.gmra.mxu1 %vm77_vm1, %v1027_v13 }
  0x8e   :  { %v1058_v29 = vpop.f32.mrf.mxu0 }
  0x8f   :  { %827 = vmatmul.msk.f32.gmra.mxu1 %vm77_vm1, %v1058_v29 }
 0x104   :  { %v101_v17 = vpop.f32.mrf.mxu1 }
 0x105   :  { %v111_v18 = vmul.f32 %v1038_v15, %v101_v17  ;;  %v828_v24 = vmul.f32 -1.442695, %v101_v17 }
 0x107   :  { %v1047_v19 = vadd.f32 %v1043_v16, %v111_v18  ;;  %857 = vpow2.f32 %v828_v24 }
 0x109   :  { %v353_v20 = vsel %vm352_vm2, %v1047_v19, -inf  ;;  %v219_v21 = vsel %vm218_vm3, %v1047_v19, -inf  ;;  %v286_v22 = vsel %vm285_vm4, %v1047_v19, -inf  ;;  %v158_v23 = vsel %vm157_vm5, %v1047_v19, -inf }
 0x10a   :  { %354 = vmax.xlane.f32.xlu0 %v353_v20  ;;  %220 = vmax.xlane.f32.xlu1 %v219_v21 }
 0x10c   :  { %v1092_v1 = vpop.f32.mrf.mxu1 }
 0x10d   :  { %v858_v25 = vpop.eup %857  ;;  %v112_v2 = vmul.f32 %v1038_v15, %v1092_v1 }
 0x10e   :  { %v125_v26 = vadd.f32 1.0, %v858_v25 }
 0x10f   :  { %v1099_v3 = vadd.f32 %v1043_v16, %v112_v2 }
 0x110   :  { %859 = vrcp.f32 %v125_v26  ;;  %v138_v43 = vand.u32 2147483648, %v125_v26  ;;  %vm132_vm7 = vweird.f32 %v125_v26  ;;  %v136_v44 = vand.u32 2147483647, %v125_v26 }
 0x111   :  { %v289_v4 = vsel %vm285_vm4, %v1099_v3, -inf }
 0x112   :  { %287 = vmax.xlane.f32.xlu0 %v286_v22  ;;  %v139_v47 = vor.u32 1.1754944e-38, %v138_v43  ;;  %vm137_vm9 = vcmp.eq.f32.partialorder %v136_v44, 8.507059e+37 }
 0x116   :  { %v860_v28 = vpop.eup %859 }
 0x117   :  { %v128_v31 = vmul.f32 %v860_v28, %v125_v26  ;;  %vm133_vm6 = vweird.f32 %v860_v28 }
 0x118   :  { %vm134_vm8 = vmor %vm132_vm7, %vm133_vm6 }
 0x119   :  { %v129_v34 = vsub.f32 1.0, %v128_v31 }
 0x11a   :  { %159 = vmax.xlane.f32.xlu0 %v158_v23 }
 0x11b   :  { %v130_v36 = vmul.f32 %v860_v28, %v129_v34 }
 0x11d   :  { %v131_v41 = vadd.f32 %v860_v28, %v130_v36 }
 0x11f   :  { %v135_v45 = vsel %vm134_vm8, %v860_v28, %v131_v41 }
 0x120   :  { %v140_v49 = vsel %vm137_vm9, %v139_v47, %v135_v45 }
 0x17d   :  { %v355_v30 = vpop.xlane.xlu0 %354  ;;  %v221_v38 = vpop.xlane.xlu1 %220 }
 0x17e   :  { %v359_v32 = vsub.f32 %v1047_v19, %v355_v30  ;;  %v225_v42 = vsub.f32 %v1047_v19, %v221_v38 }
 0x180   :  { %v361_v33 = vmul.f32 1.442695, %v359_v32  ;;  %v227_v46 = vmul.f32 1.442695, %v225_v42 }
 0x182   :  { %861 = vpow2.f32 %v361_v33 }
 0x185   :  { %v288_v35 = vpop.xlane.xlu0 %287 }
 0x186   :  { %v292_v37 = vsub.f32 %v1047_v19, %v288_v35 }
 0x188   :  { %v1064_v39 = vpop.eup %861  ;;  %v294_v40 = vmul.f32 1.442695, %v292_v37 }
 0x189   :  { %367 = vrot.lane.b32.xlu1 %v1064_v39, %s928_s0 }
 0x18a   :  { %863 = vpow2.f32 %v294_v40 }
 0x18b   :  { %865 = vpow2.f32 %v227_v46 }
 0x18d   :  { %v160_v53 = vpop.xlane.xlu0 %159 }
 0x18e   :  { %v164_v54 = vsub.f32 %v1047_v19, %v160_v53 }
 0x190   :  { %v1069_v48 = vpop.eup %863  ;;  %v166_v55 = vmul.f32 1.442695, %v164_v54 }
 0x191   :  { %300 = vrot.lane.b32.xlu2 %v1069_v48, %s929_s4  ;;  %410 = vperm.xlu1 %847, %v140_v49   ;;  %v1073_v50 = vpop.eup %865 }
 0x192   :  { %867 = vpow2.f32 %v166_v55 }
 0x198   :  { %v1080_v56 = vpop.eup %867 }
 0x199   :  { %849 = vset.pattern.permute.xlu1 %v930_v51  ;;  %233 = vrot.lane.b32.xlu2 %v1073_v50, %s931_s5  ;;  %v170_v57 = vsel %vm157_vm5, %v1080_v56, 0.0 }
 0x19a   :  { %276 = vperm.xlu1 %849, %v140_v49  }
 0x1a2   :  { %850 = vset.pattern.permute.xlu1 %v932_v52 }
 0x1c4   :  { %171 = vadd.xlane.f32.xlu1 %v170_v57 }
 0x1dd   :  { %208 = vperm.xlu1 %850, %v140_v49  }
 0x1e5   :  { %851 = vset.pattern.permute.xlu1 %v927_v27 }
 0x1eb   :  { %v301_v59 = vpop.permute.xlu2 %300 }
 0x1ec   :  { %v306_v60 = vsel %vm157_vm5, %v301_v59, 0.0 }
 0x1ed   :  { %307 = vadd.xlane.f32.xlu0 %v306_v60 }
 0x1f3   :  { %v234_v61 = vpop.permute.xlu2 %233 }
 0x1f4   :  { %v239_v62 = vsel %vm157_vm5, %v234_v61, 0.0 }
 0x1f5   :  { %240 = vadd.xlane.f32.xlu0 %v239_v62 }
 0x1fb   :  { %v368_v63 = vpop.permute.xlu1 %367 }
 0x1fc   :  { %v373_v0 = vsel %vm157_vm5, %v368_v63, 0.0  ;;  %v222_v63 = vsel %vm218_vm3, %v1099_v3, -inf }
 0x1fd   :  { %374 = vadd.xlane.f32.xlu2 %v373_v0 }
 0x203   :  { %v411_v18 = vpop.permute.xlu1 %410 }
 0x207   :  { %290 = vmax.xlane.f32.xlu1 %v289_v4 }
 0x209   :  { %343 = vperm.xlu0 %848, %v140_v49  }
 0x20c   :  { %v277_v35 = vpop.permute.xlu1 %276 }
 0x211   :  { %422 = vrot.lane.b32.xlu0 %v1027_v13, %s934_s18 }
 0x215   :  { %419 = vrot.lane.b32.xlu2 %v1027_v13, %s929_s4 }
 0x21d   :  { %425 = vrot.lane.b32.xlu2 %v1027_v13, %s935_s19 }
 0x260   :  { %v308_v5 = vpop.xlane.xlu0 %307 }
 0x261   :  { %869 = vrcp.f32 %v308_v5  ;;  %v323_v15 = vand.u32 2147483648, %v308_v5  ;;  %vm317_vm11 = vweird.f32 %v308_v5  ;;  %v321_v17 = vand.u32 2147483647, %v308_v5 }
 0x263   :  { %v324_v20 = vor.u32 1.1754944e-38, %v323_v15  ;;  %vm322_vm13 = vcmp.eq.f32.partialorder %v321_v17, 8.507059e+37 }
 0x267   :  { %v870_v6 = vpop.eup %869 }
 0x268   :  { %v313_v7 = vmul.f32 %v870_v6, %v308_v5  ;;  %v241_v8 = vpop.xlane.xlu0 %240  ;;  %vm318_vm10 = vweird.f32 %v870_v6 }
 0x269   :  { %871 = vrcp.f32 %v241_v8  ;;  %vm319_vm12 = vmor %vm317_vm11, %vm318_vm10  ;;  %v256_v38 = vand.u32 2147483648, %v241_v8  ;;  %vm250_vm6 = vweird.f32 %v241_v8  ;;  %v254_v41 = vand.u32 2147483647, %v241_v8 }
 0x26a   :  { %v314_v9 = vsub.f32 1.0, %v313_v7 }
 0x26b   :  { %v257_v46 = vor.u32 1.1754944e-38, %v256_v38  ;;  %vm255_vm9 = vcmp.eq.f32.partialorder %v254_v41, 8.507059e+37 }
 0x26c   :  { %v315_v10 = vmul.f32 %v870_v6, %v314_v9 }
 0x26e   :  { %v316_v14 = vadd.f32 %v870_v6, %v315_v10 }
 0x26f   :  { %v872_v11 = vpop.eup %871 }
 0x270   :  { %v375_v12 = vpop.xlane.xlu2 %374  ;;  %v246_v16 = vmul.f32 %v872_v11, %v241_v8  ;;  %v320_v19 = vsel %vm319_vm12, %v870_v6, %v316_v14  ;;  %vm251_vm15 = vweird.f32 %v872_v11 }
 0x271   :  { %873 = vrcp.f32 %v375_v12  ;;  %v325_v23 = vsel %vm322_vm13, %v324_v20, %v320_v19  ;;  %v390_v30 = vand.u32 2147483648, %v375_v12  ;;  %v388_v33 = vand.u32 2147483647, %v375_v12  ;;  %vm252_vm8 = vmor %vm250_vm6, %vm251_vm15 }
 0x272   :  { %v247_v21 = vsub.f32 1.0, %v246_v16  ;;  %v326_v28 = vmul.f32 %v1069_v48, %v325_v23  ;;  %vm384_vm1 = vweird.f32 %v375_v12  ;;  %v172_v48 = vpop.xlane.xlu1 %171 }
 0x273   :  { %v391_v40 = vor.u32 1.1754944e-38, %v390_v30  ;;  %vm389_vm7 = vcmp.eq.f32.partialorder %v388_v33, 8.507059e+37  ;;  %v187_v6 = vand.u32 2147483648, %v172_v48  ;;  %vm181_vm11 = vweird.f32 %v172_v48 }
 0x274   :  { %v248_v25 = vmul.f32 %v872_v11, %v247_v21  ;;  %v185_v7 = vand.u32 2147483647, %v172_v48 }
 0x275   :  { %v188_v9 = vor.u32 1.1754944e-38, %v187_v6 }
 0x276   :  { %v249_v36 = vadd.f32 %v872_v11, %v248_v25 }
 0x277   :  { %v874_v22 = vpop.eup %873 }
 0x278   :  { %v380_v24 = vmul.f32 %v874_v22, %v375_v12  ;;  %vm385_vm14 = vweird.f32 %v874_v22  ;;  %v253_v45 = vsel %vm252_vm8, %v872_v11, %v249_v36  ;;  %v420_v60 = vpop.permute.xlu2 %419 }
 0x279   :  { %vm386_vm4 = vmor %vm384_vm1, %vm385_vm14  ;;  %v258_v49 = vsel %vm255_vm9, %v257_v46, %v253_v45 }
 0x27a   :  { %v381_v26 = vsub.f32 1.0, %v380_v24  ;;  %v259_v53 = vmul.f32 %v1073_v50, %v258_v49  ;;  %v209_v55 = vpop.permute.xlu1 %208  ;;  %v356_v50 = vsel %vm352_vm2, %v1099_v3, -inf  ;;  %vm186_vm2 = vcmp.eq.f32.partialorder %v185_v7, 8.507059e+37 }
 0x27b   :  { %v344_v31 = vpop.permute.xlu0 %343 }
 0x27c   :  { %v382_v32 = vmul.f32 %v874_v22, %v381_v26  ;;  %v350_v34 = vmul.f32 %v344_v31, %v326_v28  ;;  %v283_v54 = vmul.f32 %v277_v35, %v259_v53 }
 0x27e   :  { %v383_v37 = vadd.f32 %v874_v22, %v382_v32  ;;  %433 = vrot.lane.b32.xlu2 %v350_v34, %s929_s4 }
 0x280   :  { %v387_v42 = vsel %vm386_vm4, %v874_v22, %v383_v37  ;;  %v426_v62 = vpop.permute.xlu2 %425 }
 0x281   :  { %v392_v43 = vsel %vm389_vm7, %v391_v40, %v387_v42 }
 0x282   :  { %v393_v44 = vmul.f32 %v1064_v39, %v392_v43  ;;  %v291_v57 = vpop.xlane.xlu1 %290 }
 0x283   :  { %v293_v58 = vsub.f32 %v1099_v3, %v291_v57  ;;  %v423_v61 = vpop.permute.xlu0 %422 }
 0x284   :  { %v417_v47 = vmul.f32 %v411_v18, %v393_v44 }
 0x285   :  { %v296_v59 = vmul.f32 1.442695, %v293_v58 }
 0x286   :  { %437 = vrot.lane.b32.xlu0 %v417_v47, %s928_s0  ;;  %v161_v47 = vsel %vm157_vm5, %v1099_v3, -inf }
 0x287   :  { %875 = vpow2.f32 %v296_v59 }
 0x288   :  { %877 = vrcp.f32 %v172_v48 }
 0x28d   :  { %v1110_v39 = vpop.eup %875 }
 0x28e   :  { %429 = vrot.lane.b32.xlu0 %v283_v54, %s931_s5  ;;  %302 = vrot.lane.b32.xlu1 %v1110_v39, %s929_s4  ;;  %v878_v0 = vpop.eup %877 }
 0x28f   :  { %v177_v2 = vmul.f32 %v878_v0, %v172_v48  ;;  %vm182_vm10 = vweird.f32 %v878_v0 }
 0x290   :  { %vm183_vm12 = vmor %vm181_vm11, %vm182_vm10 }
 0x291   :  { %v178_v4 = vsub.f32 1.0, %v177_v2 }
 0x293   :  { %v179_v5 = vmul.f32 %v878_v0, %v178_v4 }
 0x2a4   :  { %440 = vxpose.xlu2.b32.start [1/4] (short) (narrow) %v1027_v13, 16  ;;  %v180_v13 = vadd.f32 %v878_v0, %v179_v5 }
 0x2a6   :  { %v184_v8 = vsel %vm183_vm12, %v878_v0, %v180_v13 }
 0x2a7   :  { %v189_v10 = vsel %vm186_vm2, %v188_v9, %v184_v8  ;;  %v1162_v8 = vld [vmem:[%s1225_s3 + $0x8] sm:$0xff] }
 0x2a8   :  { %v190_v14 = vmul.f32 %v1080_v56, %v189_v10  ;;  %v829_v56 = vmul.f32 -1.442695, %v1092_v1  ;;  %v1167_v10 = vld [vmem:[%s1225_s3] sm:$0xff] }
 0x2aa   :  { %v216_v15 = vmul.f32 %v209_v55, %v190_v14  ;;  %879 = vpow2.f32 %v829_v56 }
 0x2ac   :  { %441 = vxpose.xlu2.b32.cont [2/4] (short) (narrow) %v420_v60, 16  ;;  %v501_v17 = vsel %vm157_vm5, %v216_v15, 0.0 }
 0x2b0   :  { %v880_v24 = vpop.eup %879 }
 0x2b1   :  { %v126_v28 = vadd.f32 1.0, %v880_v24 }
 0x2b3   :  { %vm147_vm3 = vweird.f32 %v126_v28  ;;  %v153_v41 = vand.u32 2147483648, %v126_v28  ;;  %v151_v43 = vand.u32 2147483647, %v126_v28 }
 0x2b4   :  { %442 = vxpose.xlu2.b32.cont [3/4] (short) (narrow) %v423_v61, 16 }
 0x2b5   :  { %v154_v44 = vor.u32 1.1754944e-38, %v153_v41  ;;  %vm152_vm15 = vcmp.eq.f32.partialorder %v151_v43, 8.507059e+37 }
 0x2b8   :  { %357 = vmax.xlane.f32.xlu0 %v356_v50 }
 0x2bc   :  { %443 = vxpose.xlu2.b32.end [4/4] (short) (narrow) %v426_v62, 16 }
 0x2c0   :  { %223 = vmax.xlane.f32.xlu0 %v222_v63 }
 0x2d8   :  { %v434_v12 = vpop.permute.xlu2 %433 }
 0x2d9   :  { %v504_v20 = vsel %vm157_vm5, %v434_v12, 0.0 }
 0x2f8   :  { %v438_v11 = vpop.permute.xlu0 %437 }
 0x2f9   :  { %490 = vmatpush.msra.mxu2 %v438_v11  ;;  %v506_v22 = vsel %vm157_vm5, %v438_v11, 0.0 }
 0x2fb   :  { %491 = vmatpush.msra.mxu2 %v434_v12 }
 0x300   :  { %v430_v16 = vpop.permute.xlu0 %429  ;;  %v303_v48 = vpop.permute.xlu1 %302 }
 0x301   :  { %v502_v18 = vsel %vm157_vm5, %v430_v16, 0.0  ;;  %492 = vmatpush.msra.mxu2 %v430_v16  ;;  %v309_v49 = vsel %vm157_vm5, %v303_v48, 0.0 }
 0x302   :  { %v503_v19 = vadd.f32 %v502_v18, %v501_v17 }
 0x303   :  { %493 = vmatpush.msra.mxu2 %v216_v15 }
 0x304   :  { %v505_v21 = vadd.f32 %v504_v20, %v503_v19 }
 0x306   :  { %v1124_v23 = vadd.f32 %v506_v22, %v505_v21 }
 0x31e   :  { %853 = vset.pattern.permute.xlu2 %v932_v52 }
 0x32b   :  { %v358_v25 = vpop.xlane.xlu0 %357 }
 0x32c   :  { %v360_v26 = vsub.f32 %v1099_v3, %v358_v25 }
 0x32e   :  { %v363_v30 = vmul.f32 1.442695, %v360_v26 }
 0x330   :  { %881 = vpow2.f32 %v363_v30 }
 0x331   :  { %883 = vrcp.f32 %v126_v28 }
 0x333   :  { %v224_v31 = vpop.xlane.xlu0 %223 }
 0x334   :  { %v226_v32 = vsub.f32 %v1099_v3, %v224_v31 }
 0x336   :  { %v1130_v33 = vpop.eup %881  ;;  %v229_v34 = vmul.f32 1.442695, %v226_v32 }
 0x337   :  { %369 = vrot.lane.b32.xlu0 %v1130_v33, %s928_s0  ;;  %v884_v52 = vpop.eup %883 }
 0x338   :  { %885 = vpow2.f32 %v229_v34  ;;  %v143_v1 = vmul.f32 %v884_v52, %v126_v28  ;;  %vm148_vm13 = vweird.f32 %v884_v52 }
 0x339   :  { %vm149_vm14 = vmor %vm147_vm3, %vm148_vm13 }
 0x33a   :  { %v144_v37 = vsub.f32 1.0, %v143_v1 }
 0x33c   :  { %v145_v38 = vmul.f32 %v884_v52, %v144_v37 }
 0x33d   :  { %v456_v35 = vpop.trf.xlu2 }
 0x33e   :  { %v1134_v36 = vpop.eup %885  ;;  %830 = vmatmul.msk.f32.vlgmr.msra.gmra.mxu2 %vm39_vm0, %v456_v35  ;;  %v146_v42 = vadd.f32 %v884_v52, %v145_v38 }
 0x33f   :  { %235 = vrot.lane.b32.xlu2 %v1134_v36, %s931_s5 }
 0x340   :  { %v150_v45 = vsel %vm149_vm14, %v884_v52, %v146_v42 }
 0x341   :  { %v155_v46 = vsel %vm152_vm15, %v154_v44, %v150_v45 }
 0x345   :  { %v457_v40 = vpop.trf.xlu2 }
 0x346   :  { %831 = vmatmul.msk.f32.gmra.mxu2 %vm39_vm0, %v457_v40 }
 0x347   :  { %617 = vrot.lane.b32.xlu2 %v1058_v29, %s934_s18 }
 0x34f   :  { %213 = vperm.xlu2 %853, %v155_v46  }
 0x361   :  { %162 = vmax.xlane.f32.xlu0 %v161_v47 }
 0x369   :  { %310 = vadd.xlane.f32.xlu0 %v309_v49 }
 0x399   :  { %v236_v53 = vpop.permute.xlu2 %235 }
 0x39a   :  { %v242_v54 = vsel %vm157_vm5, %v236_v53, 0.0 }
 0x39b   :  { %243 = vadd.xlane.f32.xlu0 %v242_v54 }
 0x3a9   :  { %v370_v55 = vpop.permute.xlu0 %369 }
 0x3aa   :  { %v376_v57 = vsel %vm157_vm5, %v370_v55, 0.0 }
 0x3ab   :  { %377 = vadd.xlane.f32.xlu1 %v376_v57 }
 0x3af   :  { %347 = vperm.xlu0 %848, %v155_v46  }
 0x3c1   :  { %v495_v4 = vpop.f32.mrf.mxu2 }
 0x3c4   :  { %414 = vperm.xlu1 %851, %v155_v46  }
 0x3c9   :  { %v498_v11 = vpop.f32.mrf.mxu2 }
 0x3cc   :  { %852 = vset.pattern.permute.xlu1 %v930_v51  ;;  %v508_v51 = vrot.slane %v1124_v23, 4 }
 0x3cd   :  { %280 = vperm.xlu1 %852, %v155_v46  }
 0x3ce   :  { %v509_v62 = vadd.f32 %v508_v51, %v1124_v23 }
 0x3d0   :  { %v510_v63 = vrot.slane %v509_v62, 2 }
 0x3d2   :  { %v511_v0 = vadd.f32 %v510_v63, %v509_v62 }
 0x3d4   :  { %v163_v58 = vpop.xlane.xlu0 %162  ;;  %v512_v2 = vrot.slane %v511_v0, 1 }
 0x3d5   :  { %v165_v59 = vsub.f32 %v1099_v3, %v163_v58  ;;  %614 = vrot.lane.b32.xlu1 %v1058_v29, %s929_s4 }
 0x3d6   :  { %v513_v13 = vadd.f32 %v512_v2, %v511_v0 }
 0x3d7   :  { %v168_v60 = vmul.f32 1.442695, %v165_v59 }
 0x3d8   :  { %v514_v7 = vmul.f32 0.03125, %v513_v13 }
 0x3d9   :  { %887 = vpow2.f32 %v168_v60 }
 0x3da   :  { %v518_v12 = vmul.f32 %v1162_v8, %v514_v7  ;;  %v517_v14 = vmul.f32 %v1167_v10, %v514_v7 }
 0x3dc   :  { %v311_v3 = vpop.xlane.xlu0 %310  ;;  %v1171_v15 = vsub.f32 %v498_v11, %v518_v12  ;;  %v1173_v17 = vsub.f32 %v495_v4, %v517_v14 }
 0x3dd   :  { %620 = vrot.lane.b32.xlu1 %v1058_v29, %s935_s19  ;;  %889 = vrcp.f32 %v311_v3  ;;  %v338_v20 = vand.u32 2147483648, %v311_v3  ;;  %vm332_vm4 = vweird.f32 %v311_v3  ;;  %v336_v22 = vand.u32 2147483647, %v311_v3 }
 0x3de   :  { %v522_v18 = vmul.f32 %v1171_v15, %v1171_v15  ;;  %v521_v21 = vmul.f32 %v1173_v17, %v1173_v17 }
 0x3df   :  { %v1153_v61 = vpop.eup %887  ;;  %v339_v25 = vor.u32 1.1754944e-38, %v338_v20  ;;  %vm337_vm7 = vcmp.eq.f32.partialorder %v336_v22, 8.507059e+37  ;;  %v545_v20 = vld [vmem:[%s1228_s6] sm:$0xff] }
 0x3e0   :  { %v173_v50 = vsel %vm157_vm5, %v1153_v61, 0.0  ;;  %v524_v56 = vsel %vm157_vm5, %v522_v18, 0.0  ;;  %v523_v26 = vsel %vm157_vm5, %v521_v21, 0.0 }
 0x3e1   :  { %174 = vadd.xlane.f32.xlu0 %v173_v50  ;;  %v525_v28 = vadd.f32 %v524_v56, %v523_v26 }
 0x3e3   :  { %v890_v5 = vpop.eup %889  ;;  %v526_v34 = vrot.slane %v525_v28, 4 }
 0x3e4   :  { %v328_v6 = vmul.f32 %v890_v5, %v311_v3  ;;  %vm333_vm1 = vweird.f32 %v890_v5 }
 0x3e5   :  { %vm334_vm6 = vmor %vm332_vm4, %vm333_vm1  ;;  %v527_v38 = vadd.f32 %v526_v34, %v525_v28 }
 0x3e6   :  { %v329_v9 = vsub.f32 1.0, %v328_v6 }
 0x3e7   :  { %v528_v43 = vrot.slane %v527_v38, 2 }
 0x3e8   :  { %v330_v16 = vmul.f32 %v890_v5, %v329_v9 }
 0x3e9   :  { %v529_v48 = vadd.f32 %v528_v43, %v527_v38 }
 0x3ea   :  { %v331_v19 = vadd.f32 %v890_v5, %v330_v16 }
 0x3eb   :  { %v530_v55 = vrot.slane %v529_v48, 1 }
 0x3ec   :  { %v335_v24 = vsel %vm334_vm6, %v890_v5, %v331_v19 }
 0x3ed   :  { %v340_v30 = vsel %vm337_vm7, %v339_v25, %v335_v24  ;;  %v531_v59 = vadd.f32 %v530_v55, %v529_v48 }
 0x3ee   :  { %v341_v32 = vmul.f32 %v1110_v39, %v340_v30 }
 0x3ef   :  { %v532_v0 = vmax.f32 %v531_v59, 1e-24 }
 0x3f1   :  { %vm539_vm15 = vweird.f32 %v532_v0 }
 0x40e   :  { %v244_v23 = vpop.xlane.xlu0 %243 }
 0x40f   :  { %891 = vrcp.f32 %v244_v23  ;;  %v271_v50 = vand.u32 2147483648, %v244_v23  ;;  %vm265_vm2 = vweird.f32 %v244_v23  ;;  %v269_v62 = vand.u32 2147483647, %v244_v23 }
 0x411   :  { %v272_v2 = vor.u32 1.1754944e-38, %v271_v50  ;;  %vm270_vm13 = vcmp.eq.f32.partialorder %v269_v62, 8.507059e+37  ;;  %v611_v50 = vld [vmem:[%s1230_s8] sm:$0x1] }
 0x415   :  { %v892_v35 = vpop.eup %891 }
 0x416   :  { %v261_v41 = vmul.f32 %v892_v35, %v244_v23  ;;  %vm266_vm12 = vweird.f32 %v892_v35 }
 0x417   :  { %vm267_vm3 = vmor %vm265_vm2, %vm266_vm12 }
 0x418   :  { %v262_v45 = vsub.f32 1.0, %v261_v41 }
 0x41a   :  { %v263_v53 = vmul.f32 %v892_v35, %v262_v45 }
 0x41c   :  { %v264_v58 = vadd.f32 %v892_v35, %v263_v53 }
 0x41e   :  { %v378_v31 = vpop.xlane.xlu1 %377  ;;  %v268_v3 = vsel %vm267_vm3, %v892_v35, %v264_v58 }
 0x41f   :  { %893 = vrcp.f32 %v378_v31  ;;  %v405_v47 = vand.u32 2147483648, %v378_v31  ;;  %vm399_vm9 = vweird.f32 %v378_v31  ;;  %v403_v39 = vand.u32 2147483647, %v378_v31 }
 0x420   :  { %v273_v4 = vsel %vm270_vm13, %v272_v2, %v268_v3  ;;  %895 = vrsqrt.f32 %v532_v0 }
 0x421   :  { %v348_v52 = vpop.permute.xlu0 %347  ;;  %v406_v54 = vor.u32 1.1754944e-38, %v405_v47  ;;  %vm404_vm11 = vcmp.eq.f32.partialorder %v403_v39, 8.507059e+37  ;;  %v274_v5 = vmul.f32 %v1134_v36, %v273_v4  ;;  %v546_v36 = vld [vmem:[%s1228_s6 + $0x8] sm:$0xff] }
 0x422   :  { %v351_v1 = vmul.f32 %v348_v52, %v341_v32  ;;  %597 = vmatpush.msra.mxu3 %v546_v36  ;;  %791 = vmatpush.msrb.mxu0 %v546_v36 }
 0x424   :  { %628 = vrot.lane.b32.xlu1 %v351_v1, %s929_s4  ;;  %598 = vmatpush.msra.mxu3 %v545_v20 }
 0x425   :  { %v894_v37 = vpop.eup %893  ;;  %792 = vmatpush.msrb.mxu0 %v545_v20 }
 0x426   :  { %v395_v40 = vmul.f32 %v894_v37, %v378_v31  ;;  %vm400_vm8 = vweird.f32 %v894_v37 }
 0x427   :  { %vm401_vm10 = vmor %vm399_vm9, %vm400_vm8  ;;  %vm579_vm9 = vcmask 130048  }
 0x428   :  { %v396_v42 = vsub.f32 1.0, %v395_v40 }
 0x42a   :  { %v397_v44 = vmul.f32 %v894_v37, %v396_v42 }
 0x42c   :  { %v398_v46 = vadd.f32 %v894_v37, %v397_v44 }
 0x42e   :  { %v402_v49 = vsel %vm401_vm10, %v894_v37, %v398_v46 }
 0x42f   :  { %v407_v57 = vsel %vm404_vm11, %v406_v54, %v402_v49 }
 0x430   :  { %v408_v60 = vmul.f32 %v1130_v33, %v407_v57  ;;  %v896_v33 = vpop.eup %895 }
 0x431   :  { %v534_v7 = vmul.f32 %v896_v33, %v532_v0  ;;  %vm540_vm14 = vweird.f32 %v896_v33 }
 0x432   :  { %vm541_vm1 = vmor %vm539_vm15, %vm540_vm14 }
 0x433   :  { %v535_v9 = vmul.f32 %v896_v33, %v534_v7 }
 0x435   :  { %v536_v11 = vmul.f32 0.5, %v535_v9 }
 0x436   :  { %v415_v51 = vpop.permute.xlu1 %414 }
 0x437   :  { %v418_v63 = vmul.f32 %v415_v51, %v408_v60  ;;  %v537_v12 = vsub.f32 1.5, %v536_v11 }
 0x439   :  { %632 = vrot.lane.b32.xlu2 %v418_v63, %s928_s0  ;;  %v538_v14 = vmul.f32 %v896_v33, %v537_v12 }
 0x43b   :  { %v542_v16 = vsel %vm541_vm1, %v896_v33, %v538_v14 }
 0x43c   :  { %v543_v18 = vmul.f32 %v542_v16, %v1173_v17  ;;  %v544_v19 = vmul.f32 %v542_v16, %v1171_v15  ;;  %v618_v17 = vpop.permute.xlu2 %617 }
 0x43f   :  { %v281_v13 = vpop.permute.xlu1 %280 }
 0x440   :  { %v284_v6 = vmul.f32 %v281_v13, %v274_v5 }
 0x442   :  { %624 = vrot.lane.b32.xlu1 %v284_v6, %s931_s5 }
 0x444   :  { %v214_v15 = vpop.permute.xlu2 %213 }
 0x447   :  { %v615_v21 = vpop.permute.xlu1 %614 }
 0x44f   :  { %v621_v22 = vpop.permute.xlu1 %620 }
 0x454   :  { %v175_v23 = vpop.xlane.xlu0 %174 }
 0x455   :  { %897 = vrcp.f32 %v175_v23  ;;  %vm196_vm6 = vweird.f32 %v175_v23  ;;  %v200_v32 = vand.u32 2147483647, %v175_v23 }
 0x457   :  { %vm201_vm8 = vcmp.eq.f32.partialorder %v200_v32, 8.507059e+37 }
 0x45b   :  { %v898_v25 = vpop.eup %897 }
 0x45c   :  { %v192_v26 = vmul.f32 %v898_v25, %v175_v23  ;;  %vm197_vm4 = vweird.f32 %v898_v25 }
 0x45d   :  { %vm198_vm7 = vmor %vm196_vm6, %vm197_vm4 }
 0x45e   :  { %v193_v28 = vsub.f32 1.0, %v192_v26 }
 0x45f   :  { %547 = vxpose.xlu2.b32.start [1/2] (short) (narrow) %v543_v18, 8 }
 0x460   :  { %v194_v30 = vmul.f32 %v898_v25, %v193_v28 }
 0x462   :  { %v195_v31 = vadd.f32 %v898_v25, %v194_v30 }
 0x464   :  { %v199_v34 = vsel %vm198_vm7, %v898_v25, %v195_v31 }
 0x467   :  { %548 = vxpose.xlu2.b32.end [2/2] (short) (narrow) %v544_v19, 8 }
 0x477   :  { %635 = vxpose.xlu1.b32.start [1/4] (short) (narrow) %v1058_v29, 16  ;;  %v202_v29 = vand.u32 2147483648, %v175_v23 }
 0x479   :  { %v203_v52 = vor.u32 1.1754944e-38, %v202_v29 }
 0x47b   :  { %v204_v1 = vsel %vm201_vm8, %v203_v52, %v199_v34 }
 0x47c   :  { %v205_v35 = vmul.f32 %v1153_v61, %v204_v1  ;;  %v603_v61 = vld [vmem:[%s1229_s7] sm:$0xff] }
 0x47e   :  { %v217_v38 = vmul.f32 %v214_v15, %v205_v35 }
 0x47f   :  { %636 = vxpose.xlu1.b32.cont [2/4] (short) (narrow) %v615_v21, 16 }
 0x480   :  { %v696_v44 = vsel %vm157_vm5, %v217_v38, 0.0 }
 0x487   :  { %637 = vxpose.xlu1.b32.cont [3/4] (short) (narrow) %v618_v17, 16 }
 0x48f   :  { %638 = vxpose.xlu1.b32.end [4/4] (short) (narrow) %v621_v22, 16 }
 0x493   :  { %v633_v56 = vpop.permute.xlu2 %632 }
 0x494   :  { %685 = vmatpush.msrb.mxu3 %v633_v56  ;;  %v701_v53 = vsel %vm157_vm5, %v633_v56, 0.0 }
 0x496   :  { %v629_v24 = vpop.permute.xlu1 %628 }
 0x497   :  { %686 = vmatpush.msrb.mxu3 %v629_v24  ;;  %v699_v47 = vsel %vm157_vm5, %v629_v24, 0.0 }
 0x4b4   :  { %v625_v37 = vpop.permute.xlu1 %624 }
 0x4b5   :  { %687 = vmatpush.msrb.mxu3 %v625_v37  ;;  %v697_v43 = vsel %vm157_vm5, %v625_v37, 0.0 }
 0x4b6   :  { %v698_v45 = vadd.f32 %v697_v43, %v696_v44 }
 0x4b7   :  { %688 = vmatpush.msrb.mxu3 %v217_v38 }
 0x4b8   :  { %v700_v39 = vadd.f32 %v699_v47, %v698_v45 }
 0x4ba   :  { %v702_v55 = vadd.f32 %v701_v53, %v700_v39 }
 0x4bc   :  { %v703_v59 = vrot.slane %v702_v55, 4 }
 0x4be   :  { %v704_v62 = vadd.f32 %v703_v59, %v702_v55 }
 0x4c0   :  { %v705_v3 = vrot.slane %v704_v62, 2 }
 0x4c2   :  { %v706_v0 = vadd.f32 %v705_v3, %v704_v62 }
 0x4c4   :  { %v707_v2 = vrot.slane %v706_v0, 1 }
 0x4c6   :  { %v708_v4 = vadd.f32 %v707_v2, %v706_v0 }
 0x4c8   :  { %v709_v5 = vmul.f32 0.03125, %v708_v4 }
 0x4ca   :  { %v712_v6 = vmul.f32 %v709_v5, %v1167_v10  ;;  %v713_v7 = vmul.f32 %v709_v5, %v1162_v8 }
 0x4f8   :  { %v563_v40 = vpop.trf.xlu2 }
 0x4f9   :  { %832 = vmatmul.msk.f32.vlgmr.msra.gmra.mxu3 %vm579_vm9, %v563_v40  ;;  %v805_v40 = vld [vmem:[%s1230_s8] sm:$0x1] }
 0x51b   :  { %v651_v41 = vpop.trf.xlu1 }
 0x51c   :  { %833 = vmatmul.msk.f32.vlgmr.msrb.gmra.mxu3 %vm39_vm0, %v651_v41 }
 0x523   :  { %v652_v42 = vpop.trf.xlu1 }
 0x524   :  { %834 = vmatmul.msk.f32.gmra.mxu3 %vm39_vm0, %v652_v42 }
 0x57c   :  { %v600_v46 = vpop.f32.mrf.mxu3 }
 0x57d   :  { %v604_v48 = vmul.f32 %v603_v61, %v600_v46 }
 0x57f   :  { %v605_v49 = vrot.slane %v604_v48, 4 }
 0x581   :  { %v606_v54 = vadd.f32 %v605_v49, %v604_v48 }
 0x583   :  { %v607_v57 = vrot.slane %v606_v54, 2 }
 0x585   :  { %v608_v58 = vadd.f32 %v607_v57, %v606_v54 }
 0x587   :  { %v609_v60 = vrot.slane %v608_v58, 1 }
 0x589   :  { %v610_v51 = vadd.f32 %v609_v60, %v608_v58 }
 0x58b   :  { %v612_v63 = vadd.f32 %v611_v50, %v610_v51 }
 0x58d   :  { %613 = vst [vmem:[#allocation2] sm:$0x1] %v612_v63 }
 0x59f   :  { %v690_v13 = vpop.f32.mrf.mxu3 }
 0x5a0   :  { %v714_v33 = vsub.f32 %v690_v13, %v712_v6 }
 0x5a2   :  { %v716_v11 = vmul.f32 %v714_v33, %v714_v33 }
 0x5a4   :  { %v718_v16 = vsel %vm157_vm5, %v716_v11, 0.0 }
 0x5a7   :  { %v693_v9 = vpop.f32.mrf.mxu3 }
 0x5a8   :  { %v715_v12 = vsub.f32 %v693_v9, %v713_v7 }
 0x5aa   :  { %v717_v14 = vmul.f32 %v715_v12, %v715_v12 }
 0x5ac   :  { %v719_v18 = vsel %vm157_vm5, %v717_v14, 0.0 }
 0x5ad   :  { %v720_v19 = vadd.f32 %v719_v18, %v718_v16 }
 0x5af   :  { %v721_v36 = vrot.slane %v720_v19, 4 }
 0x5b1   :  { %v722_v20 = vadd.f32 %v721_v36, %v720_v19 }
 0x5b3   :  { %v723_v21 = vrot.slane %v722_v20, 2 }
 0x5b5   :  { %v724_v17 = vadd.f32 %v723_v21, %v722_v20 }
 0x5b7   :  { %v725_v15 = vrot.slane %v724_v17, 1 }
 0x5b9   :  { %v726_v22 = vadd.f32 %v725_v15, %v724_v17 }
 0x5bb   :  { %v727_v23 = vmax.f32 %v726_v22, 1e-24 }
 0x5bd   :  { %899 = vrsqrt.f32 %v727_v23  ;;  %vm734_vm10 = vweird.f32 %v727_v23 }
 0x5c3   :  { %v900_v10 = vpop.eup %899 }
 0x5c4   :  { %v729_v56 = vmul.f32 %v900_v10, %v727_v23  ;;  %vm735_vm0 = vweird.f32 %v900_v10 }
 0x5c5   :  { %vm736_vm11 = vmor %vm734_vm10, %vm735_vm0 }
 0x5c6   :  { %v730_v8 = vmul.f32 %v900_v10, %v729_v56 }
 0x5c8   :  { %v731_v24 = vmul.f32 0.5, %v730_v8 }
 0x5ca   :  { %v732_v25 = vsub.f32 1.5, %v731_v24 }
 0x5cc   :  { %v733_v26 = vmul.f32 %v900_v10, %v732_v25 }
 0x5ce   :  { %v737_v28 = vsel %vm736_vm11, %v900_v10, %v733_v26 }
 0x5cf   :  { %v738_v30 = vmul.f32 %v737_v28, %v714_v33  ;;  %v739_v31 = vmul.f32 %v737_v28, %v715_v12 }
 0x5d1   :  { %742 = vxpose.xlu0.b32.start [1/2] (short) (narrow) %v738_v30, 8 }
 0x5d9   :  { %743 = vxpose.xlu0.b32.end [2/2] (short) (narrow) %v739_v31, 8 }
 0x640   :  { %854 = vset.pattern.permute.xlu0 %v927_v27 }
 0x675   :  { %v758_v29 = vpop.trf.xlu0 }
 0x676   :  { %835 = vmatmul.msk.f32.vlgmr.msrb.gmra.mxu0 %vm579_vm9, %v758_v29 }
 0x6f3   :  { %v794_v32 = vpop.f32.mrf.mxu0 }
 0x6f4   :  { %v798_v34 = vmul.f32 %v794_v32, %v603_v61 }
 0x6f6   :  { %v799_v52 = vrot.slane %v798_v34, 4 }
 0x6f8   :  { %v800_v1 = vadd.f32 %v799_v52, %v798_v34 }
 0x6fa   :  { %v801_v35 = vrot.slane %v800_v1, 2 }
 0x6fc   :  { %v802_v37 = vadd.f32 %v801_v35, %v800_v1 }
 0x6fe   :  { %v803_v38 = vrot.slane %v802_v37, 1 }
 0x700   :  { %v804_v27 = vadd.f32 %v803_v38, %v802_v37 }
 0x702   :  { %v806_v41 = vadd.f32 %v805_v40, %v804_v27 }
 0x704   :  { %807 = vst [vmem:[#allocation2 + $0x1] sm:$0x1] %v806_v41 }
 0x705   :  { %818 = dma.vmem_to_hbm [thread:$0]  %s814_s10, 32, %s816_s13, [#allocation3]  }
 0x706   :  { %925 = dma.done.wait [#allocation3], 32  }
 0x707   :  { %926 = vsyncadd [#allocation3], 4294967264 }
 0x708   :  { %823 = vsyncpa [#allocation3], 1 }

</bundles_post_ra>
